<compile_context>
chip_gen: v6e
topology: v6e:2x2x1
jax: 0.10.0
libtpu: 0.0.40
codegen_flags: <defaults>
</compile_context>

<pallas_src>
import functools
import math

import jax
import jax.numpy as jnp
from jax.experimental import pallas as pl
from jax.experimental.pallas import tpu as pltpu


def _layer_norm_kernel(x_ref, w_ref, b_ref, o_ref, *, eps, chunk):
    # x_ref/o_ref: (TM, H) tile; w_ref/b_ref: (1, H) f32 pinned to block (0,0)
    # so they are not re-DMA'd across grid steps.
    w = w_ref[...]
    b = b_ref[...]

    def _norm_rows(x):
        x = x.astype(jnp.float32)
        mean = jnp.mean(x, axis=-1, keepdims=True)
        centered = x - mean
        var = jnp.mean(centered * centered, axis=-1, keepdims=True)
        inv = jax.lax.rsqrt(var + eps)          # EUP slot (effectively free)
        return centered * inv * w + b

    tm = x_ref.shape[0]
    n_chunks = tm // chunk
    if n_chunks <= 1:
        o_ref[...] = _norm_rows(x_ref[...]).astype(o_ref.dtype)
    else:
        # fori_loop (not a Python for) so the f32 temporaries' live ranges are
        # actually bounded to one chunk.
        def body(c, carry):
            r0 = pl.multiple_of(c * chunk, chunk)
            y = _norm_rows(x_ref[pl.ds(r0, chunk), :])
            o_ref[pl.ds(r0, chunk), :] = y.astype(o_ref.dtype)
            return carry

        jax.lax.fori_loop(0, n_chunks, body, 0)


def _sublane_pack(dtype):
    # Sub-32-bit dtypes pack along sublanes: keep row tiles a multiple of the
    # pack so tiles stay unmasked/aligned.
    return {4: 8, 2: 16, 1: 32}.get(jnp.dtype(dtype).itemsize, 8)


def _tensorcores_per_chip():
    # v5e/v6e have 1 TensorCore per chip; v4 / v7x have 2 (megacore).
    try:
        kind = jax.devices()[0].device_kind.lower()
    except Exception:
        return 1
    if "v4" in kind or "v7" in kind or "7x" in kind:
        return 2
    return 1


def _default_vmem_budget():
    # Budget for the whole kernel working set (IO double-buffers + f32
    # compute scratch).  Derived from physical VMEM when the query works,
    # otherwise assume the smallest chip (v7x, 64 MiB).
    try:
        cap = pltpu.get_tpu_info().vmem_capacity_bytes
    except Exception:
        cap = 64 << 20
    return max(16 << 20, min(48 << 20, cap // 2))


def _choose_row_tile(rows, hidden, dtype, vmem_budget_bytes, min_grid_steps,
                     chunk):
    """Largest TM whose double-buffered in+out tiles *plus* the chunk-sized
    f32 compute scratch fit the VMEM budget, backed off so the grid keeps
    enough steps for pipelining (and both TCs on megacore chips)."""
    itemsize = jnp.dtype(dtype).itemsize
    pack = _sublane_pack(dtype)
    bytes_per_row_io = 4 * hidden * itemsize     # 2x dbuf input + 2x dbuf out
    # f32 intermediates (x_f32, centered, y) are per-chunk, plus pinned params.
    fixed = 3 * chunk * hidden * 4 + 4 * hidden * 4
    avail = max(vmem_budget_bytes - fixed, 4 * pack * hidden * itemsize)
    tm = max(pack, avail // bytes_per_row_io)
    tm = max(pack, (tm // pack) * pack)
    # No point exceeding the pack-rounded row count; soft cap of 4096 rows.
    tm = min(tm, max(pack, pl.cdiv(rows, pack) * pack), 4096)
    # Keep enough grid steps to pipeline / feed both cores.
    while tm > pack and pl.cdiv(rows, tm) < min_grid_steps:
        tm = max(pack, ((tm // 2) // pack) * pack)
    # Keep TM a multiple of the compute chunk so the in-kernel loop is exact.
    if tm >= chunk:
        tm = max(chunk, (tm // chunk) * chunk)
    return tm


def fused_layer_norm(x, weight=None, bias=None, eps=1e-5, *,
                     row_tile=None, row_chunk=256,
                     vmem_budget_bytes=None, min_grid_steps=None):
    """LayerNorm over the last dimension of x; matches F.layer_norm with
    normalized_shape = (x.shape[-1],).  weight/bias may be None
    (elementwise_affine=False) -> identity affine."""
    orig_shape = x.shape
    hidden = orig_shape[-1]
    rows = int(math.prod(orig_shape[:-1])) if len(orig_shape) > 1 else 1
    dtype = x.dtype
    itemsize = jnp.dtype(dtype).itemsize
    pack = _sublane_pack(dtype)

    if weight is None:
        weight = jnp.ones((hidden,), dtype=jnp.float32)
    if bias is None:
        bias = jnp.zeros((hidden,), dtype=jnp.float32)
    # Pre-cast params to f32 in the wrapper: they are pinned to block (0, 0)
    # so the extra HBM bytes are negligible and the per-step astype vanishes.
    w2 = weight.astype(jnp.float32).reshape(1, hidden)
    b2 = bias.astype(jnp.float32).reshape(1, hidden)

    if vmem_budget_bytes is None:
        vmem_budget_bytes = _default_vmem_budget()
    if min_grid_steps is None:
        min_grid_steps = 4 * _tensorcores_per_chip()

    # Compute chunk: pack-aligned, and its 3 f32 temporaries must fit in
    # roughly half the budget even for very wide hidden.
    chunk = max(pack, (int(row_chunk) // pack) * pack)
    max_chunk = max(pack, (vmem_budget_bytes // 2) // (3 * hidden * 4))
    chunk = min(chunk, max(pack, (max_chunk // pack) * pack))

    # Row-tile selection (VMEM-budgeted incl. scratch, pack aligned).
    if row_tile is None:
        tm = _choose_row_tile(rows, hidden, dtype, vmem_budget_bytes,
                              min_grid_steps, chunk)
    else:
        tm = max(pack, (int(row_tile) // pack) * pack)
    chunk = min(chunk, tm)
    if tm % chunk != 0:
        # Both are pack multiples, so the gcd stays pack-aligned.
        chunk = math.gcd(tm, chunk)

    x2 = x.reshape(rows, hidden)
    # No padding / slicing: Pallas masks the partial tail block (garbage tail
    # rows are per-row independent and their writes are dropped).
    grid = (pl.cdiv(rows, tm),)

    # Explicit scoped-VMEM limit sized to tiles + f32 scratch (+30% headroom);
    # v5e's default scoped limit is only 16 MiB, v7x physical VMEM is 64 MiB.
    io_tile_bytes = 4 * tm * hidden * itemsize
    f32_scratch = 3 * chunk * hidden * 4
    param_bytes = 4 * hidden * 4
    vmem_limit = int((io_tile_bytes + f32_scratch + param_bytes) * 1.3) + (1 << 20)
    vmem_limit = min(56 << 20, max(8 << 20, vmem_limit))

    cost = pl.CostEstimate(
        flops=8 * rows * hidden,
        transcendentals=rows,
        bytes_accessed=2 * rows * hidden * itemsize + 2 * hidden * 4,
    )

    # TODO(synk): if hidden % 128 != 0 (e.g. the tiny demo H=32), stores lower
    # to masked vst.msk; a lane-padded repack (pad H to 128, mask the mean/var
    # divisor) would be needed for full store bandwidth; correctness is fine.
    out = pl.pallas_call(
        functools.partial(_layer_norm_kernel, eps=float(eps), chunk=chunk),
        out_shape=jax.ShapeDtypeStruct((rows, hidden), dtype),
        grid_spec=pltpu.PrefetchScalarGridSpec(
            num_scalar_prefetch=0,
            grid=grid,
            in_specs=[
                pl.BlockSpec((tm, hidden), lambda i: (i, 0)),
                pl.BlockSpec((1, hidden), lambda i: (0, 0)),
                pl.BlockSpec((1, hidden), lambda i: (0, 0)),
            ],
            out_specs=pl.BlockSpec((tm, hidden), lambda i: (i, 0)),
        ),
        compiler_params=pltpu.CompilerParams(
            # TODO(synk): on v7x verify the row axis shards across both
            # TensorCores; if Mosaic doesn't split it, switch this axis to
            # pltpu.CORE_PARALLEL.
            dimension_semantics=("parallel",),
            vmem_limit_bytes=vmem_limit,
        ),
        cost_estimate=cost,
    )(x2, w2, b2)

    return out.reshape(orig_shape)


if __name__ == "__main__":
    # FusedLayerNorm(normalized_shape=hidden): weight=ones, bias=zeros
    # (reset_parameters), eps=1e-5.
    batch, seq, hidden = 2, 8, 32
    key = jax.random.PRNGKey(0)
    x = jax.random.normal(key, (batch, seq, hidden), dtype=jnp.float32)
    weight = jnp.ones((hidden,), dtype=jnp.float32)
    bias = jnp.zeros((hidden,), dtype=jnp.float32)

    def ref_ln(x, w, b, eps):
        mean = jnp.mean(x, axis=-1, keepdims=True)
        var = jnp.mean((x - mean) ** 2, axis=-1, keepdims=True)
        return (x - mean) * jax.lax.rsqrt(var + eps) * w + b

    y = fused_layer_norm(x, weight, bias, eps=1e-5)
    y = jax.block_until_ready(y)
    assert jnp.allclose(y, ref_ln(x, weight, bias, 1e-5), atol=1e-5, rtol=1e-5), \
        "mismatch vs reference"

    # Odd row count exercises the masked partial-tail-block path
    # (rows=15 not divisible by the row tile).
    x_odd = jax.random.normal(jax.random.PRNGKey(1), (3, 5, hidden),
                              dtype=jnp.float32)
    y_odd = jax.block_until_ready(fused_layer_norm(x_odd, weight, bias))
    assert jnp.allclose(y_odd, ref_ln(x_odd, weight, bias, 1e-5),
                        atol=1e-5, rtol=1e-5), "mismatch vs reference (tail)"

    # elementwise_affine=False path (weight/bias None).
    y_na = jax.block_until_ready(fused_layer_norm(x, None, None, eps=1e-5))
    assert jnp.allclose(
        y_na, ref_ln(x, jnp.ones((hidden,)), jnp.zeros((hidden,)), 1e-5),
        atol=1e-5, rtol=1e-5), "mismatch vs reference (no affine)"

    print("KERNEL_OK")
</pallas_src>

<mosaic_0001>
module attributes {stable_mosaic.version = 11 : i64} {
  func.func @_layer_norm_kernel(%arg0: i32, %arg1: memref<8x32xf32, #tpu.memory_space<vmem>>, %arg2: memref<1x32xf32, #tpu.memory_space<vmem>>, %arg3: memref<1x32xf32, #tpu.memory_space<vmem>>, %arg4: memref<8x32xf32, #tpu.memory_space<vmem>>) attributes {dimension_semantics = [#tpu.dimension_semantics<parallel>], iteration_bounds = array<i64: 2>, scalar_prefetch = 0 : i64, scratch_operands = 0 : i64, tpu.core_type = #tpu.core_type<tc>, window_params = [{transform_indices = @transform_0, window_bounds = array<i64: 8, 32>}, {pipeline_mode = #tpu.pipeline_mode<synchronous>, transform_indices = @transform_1, window_bounds = array<i64: 1, 32>}, {pipeline_mode = #tpu.pipeline_mode<synchronous>, transform_indices = @transform_2, window_bounds = array<i64: 1, 32>}, {transform_indices = @transform_3, window_bounds = array<i64: 8, 32>}]} {
    %c0 = arith.constant 0 : index
    %c0_0 = arith.constant 0 : index
    %0 = vector.load %arg2[%c0, %c0_0] : memref<1x32xf32, #tpu.memory_space<vmem>>, vector<1x32xf32>
    %c0_1 = arith.constant 0 : index
    %c0_2 = arith.constant 0 : index
    %1 = vector.load %arg3[%c0_1, %c0_2] : memref<1x32xf32, #tpu.memory_space<vmem>>, vector<1x32xf32>
    %c0_3 = arith.constant 0 : index
    %c0_4 = arith.constant 0 : index
    %2 = vector.load %arg1[%c0_3, %c0_4] : memref<8x32xf32, #tpu.memory_space<vmem>>, vector<8x32xf32>
    %cst = arith.constant dense<0.000000e+00> : vector<8xf32>
    %3 = vector.multi_reduction <add>, %2, %cst [1] : vector<8x32xf32> to vector<8xf32>
    %4 = vector.shape_cast %3 : vector<8xf32> to vector<8x1xf32>
    %cst_5 = arith.constant 3.200000e+01 : f32
    %5 = vector.broadcast %cst_5 : f32 to vector<8x1xf32>
    %6 = arith.divf %4, %5 : vector<8x1xf32>
    %7 = vector.broadcast %6 : vector<8x1xf32> to vector<8x32xf32>
    %8 = arith.subf %2, %7 : vector<8x32xf32>
    %9 = arith.mulf %8, %8 : vector<8x32xf32>
    %cst_6 = arith.constant dense<0.000000e+00> : vector<8xf32>
    %10 = vector.multi_reduction <add>, %9, %cst_6 [1] : vector<8x32xf32> to vector<8xf32>
    %11 = vector.shape_cast %10 : vector<8xf32> to vector<8x1xf32>
    %cst_7 = arith.constant 3.200000e+01 : f32
    %12 = vector.broadcast %cst_7 : f32 to vector<8x1xf32>
    %13 = arith.divf %11, %12 : vector<8x1xf32>
    %cst_8 = arith.constant 9.99999974E-6 : f32
    %14 = vector.broadcast %cst_8 : f32 to vector<8x1xf32>
    %15 = arith.addf %13, %14 : vector<8x1xf32>
    %16 = math.rsqrt %15 : vector<8x1xf32>
    %17 = vector.broadcast %16 : vector<8x1xf32> to vector<8x32xf32>
    %18 = arith.mulf %8, %17 : vector<8x32xf32>
    %19 = vector.broadcast %0 : vector<1x32xf32> to vector<8x32xf32>
    %20 = arith.mulf %18, %19 : vector<8x32xf32>
    %21 = vector.broadcast %1 : vector<1x32xf32> to vector<8x32xf32>
    %22 = arith.addf %20, %21 : vector<8x32xf32>
    %c0_9 = arith.constant 0 : index
    %c0_10 = arith.constant 0 : index
    %23 = vector.load %arg4[%c0_9, %c0_10] : memref<8x32xf32, #tpu.memory_space<vmem>>, vector<8x32xf32>
    tpu.vector_store %arg4[%c0_9, %c0_10], %22 {strides = array<i32>} : memref<8x32xf32, #tpu.memory_space<vmem>>, vector<8x32xf32>,
    return
  }
  func.func @transform_0(%arg0: i32) -> (i32, i32) {
    %c0_i32 = arith.constant 0 : i32
    %c0_i32_0 = arith.constant 0 : i32
    return %arg0, %c0_i32 : i32, i32
  }
  func.func @transform_1(%arg0: i32) -> (i32, i32) {
    %c0_i32 = arith.constant 0 : i32
    %c0_i32_0 = arith.constant 0 : i32
    %c0_i32_1 = arith.constant 0 : i32
    return %c0_i32, %c0_i32_0 : i32, i32
  }
  func.func @transform_2(%arg0: i32) -> (i32, i32) {
    %c0_i32 = arith.constant 0 : i32
    %c0_i32_0 = arith.constant 0 : i32
    %c0_i32_1 = arith.constant 0 : i32
    return %c0_i32, %c0_i32_0 : i32, i32
  }
  func.func @transform_3(%arg0: i32) -> (i32, i32) {
    %c0_i32 = arith.constant 0 : i32
    %c0_i32_0 = arith.constant 0 : i32
    return %arg0, %c0_i32 : i32, i32
  }
}

</mosaic_0001>

<bundles_post_ra>
// kernel: tpu_custom_call.1
= control target key start
LH: loop header
LB: loop body
LE: loop exit
PB: predicated region body
PF: predicated region fallthrough
CT: control target
= control target key end

     0   :  { %8 = vsyncpa [#allocation3], 0  ;;  %s631_s0 = inlined_call_operand.hbm [shape: f32[16,32], index: 0, kind: input, shape index: {}]   ;;  %s632_s1 = inlined_call_operand.vmem [shape: f32[1,32], index: 1, kind: input, shape index: {}]   ;;  %s633_s2 = inlined_call_operand.vmem [shape: f32[1,32], index: 2, kind: input, shape index: {}]   ;;  %s634_s3 = inlined_call_operand.hbm [shape: f32[16,32], index: 3, kind: output, shape index: {}]  }
   0x1   :  { %10 = vsyncpa [#allocation3 + $0x1], 0 }
   0x2   :  { %11 = vsyncpa [#allocation4], 0 }
   0x3   :  { %13 = vsyncpa [#allocation4 + $0x1], 0  ;;  %s481_s12 = smov 0   ;;  %s483_s13 = smov 0  }
   0x4   :  { %s485_s14 = smov 0   ;;  %s487_s15 = smov 0  }
   0x5 LB: > { %s502_s16 = sadd.s32 4294967295, %s457_s15   ;;  %s303_s17 = sadd.s32 4294967294, %s457_s15   ;;  %s457_s15 = sphi %s487_s15, %s651_s15   ;;  %s453_s14 = sphi %s485_s14, %s650_s14   ;;  %s449_s13 = sphi %s483_s13, %s649_s13   ;;  %s445_s12 = sphi %s481_s12, %s648_s12  }
   0x6   : > { %s506_s18 = sadd.s32 1, %s457_s15   ;;  %s26_s19 = sadd.s32 1, %s453_s14 }
   0x7   : > { %s23_s20 = ssub.s32 %s457_s15, %s506_s18  ;;  %p33_p0 = scmp.ne.s32.totalorder %s453_s14, %s449_s13 }
   0x8   : > { %p24_p1 = scmp.eq.s32.totalorder %s23_s20, 0  ;;  %p34_p2 = scmp.eq.s32.totalorder %s457_s15, 0 }
   0x9   : > { %p39_p3 = scmp.ne.s32.totalorder %s449_s13, %s445_s12  ;;  %p40_p4 = scmp.eq.s32.totalorder %s502_s16, 0 }
   0xa   : > { %s518_s21 = scalar_select %p24_p1, %s453_s14, %s26_s19  }
   0xb   : > { %p520_p5 = por %p34_p2, %p33_p0  ;;  %p524_p6 = por %p40_p4, %p39_p3 }
   0xc   : > { %p105_p7 = scmp.eq.s32.totalorder %s502_s16, 1  ;;  %p111_p8 = scmp.eq.s32.totalorder %s303_s17, 1 }
   0xd   : > { %s638_s23 = scalar_select %p524_p6, 1, 0 }
   0xe   : > { %p329_p10 = scmp.lt.s32.totalorder %s457_s15, 2  ;;  %p531_p11 = por %p105_p7, %p33_p0 }
   0xf   : > { %p535_p12 = por %p111_p8, %p39_p3  ;;  %s137_s26 = sand.u32 1, %s453_s14  }
  0x10   : > { %s639_s24 = scalar_select %p531_p11, 1, 0 }
  0x11   : > { %s640_s25 = scalar_select %p535_p12, 1, 0 }
  0x12   : > { %s307_s27 = sshll.u32 %s457_s15, 7  ;;  %s306_s28 = sshll.u32 %s137_s26, 3 }
  0x13   : > { %s544_s4 = scalar_lea.hbm %s631_s0, %s307_s27  ;;  %s141_s5 = scalar_lea.vmem [#allocation2], %s306_s28 }
  0x14   : > { %s148_s6 = sshll.u32 %s141_s5, 4  ;;  %p548_p13 = pnand %p329_p10, %p520_p5  ;;  %s552_s6 = int_to_ptr.vmem [resolvable:$true] %s148_s6 }
  0x15   : > { %s138_s8 = scalar_lea.sflag [#allocation3], %s137_s26  ;;  %s365_s9 = scalar_lea.hbm %s544_s4, 128 }
  0x16   : > { %p366_p2 = scmp.ne.s32.totalorder %s544_s4, %s365_s9  ;;  %p367_p3 = pneg %p548_p13 }
  0x17   : > { %s370_s17 = scalar_lea.hbm %s631_s0, 256  ;;  %p371_p5 = scmp.lt.s32.totalorder %s544_s4, %s631_s0 }
  0x18   : > { %p368_p4 = pnand %p367_p3, %p366_p2  ;;  %p372_p8 = scmp.lt.s32.totalorder %s370_s17, %s365_s9 }
  0x1a   : > { %p369_p7 = pneg %p368_p4  ;;  %p373_p10 = por %p372_p8, %p371_p5 }
  0x1c   : > { %p374_p9 = pnand %p373_p10, %p369_p7 }
  0x1e   : > { %377 = shalt.err (!%p374_p9)
}
  0x1f   : > { %s378_s22 = scalar_lea.vmem %s552_s6, 128  ;;  %s459_s26 = smov [#allocation2]  }
  0x20   : > { %p379_p0 = scmp.ne.s32.totalorder %s552_s6, %s378_s22  ;;  %s383_s27 = sshll.u32 %s459_s26, 4  ;;  %s384_s27 = int_to_ptr.vmem [resolvable:$false] %s383_s27 }
  0x21   : > { %s385_s28 = scalar_lea.vmem %s384_s27, 256  ;;  %p386_p4 = scmp.lt.s32.totalorder %s552_s6, %s384_s27 }
  0x22   : > { %p381_p1 = pnand %p379_p0, %p367_p3  ;;  %p387_p12 = scmp.lt.s32.totalorder %s385_s28, %s378_s22 }
  0x24   : > { %p382_p2 = pneg %p381_p1  ;;  %p388_p11 = por %p387_p12, %p386_p4 }
  0x26   : > { %p389_p6 = pnand %p388_p11, %p382_p2 }
  0x28   : > { %392 = shalt.err (!%p389_p6)
}
  0x29   : > { %324 = dma.hbm_to_vmem [thread:$0]  (!%p548_p13), %s544_s4, 128, %s552_s6, %s138_s8  }
  0x2a   : > { %p642_p9 = scmp.lt.s32.totalorder %s457_s15, 3  ;;  %p643_p7 = scmp.ge.s32.totalorder %s457_s15, 1 }
  0x2c   : > { %p154_p0 = pnand %p643_p7, %p642_p9 }
  0x2d   : > { %s579_s29 = sand.u32 (!%p154_p0), 1, %s449_s13   ;;  %p644_p6 = scmp.ne.s32.totalorder (!%p154_p0), %s638_s23, 0 }
  0x2e   : > { %157 = sbr.rel (%p154_p0) target bundleno = 374 (0x176), region = 32  ;;  %s309_s30 = sshll.u32 (!%p154_p0), %s579_s29, 3 }
  0x2f   : > { %s160_s5 = scalar_lea.sflag (!%p154_p0), [#allocation3], %s579_s29  ;;  %s163_s9 = scalar_lea.vmem (!%p154_p0), [#allocation2], %s309_s30 }
  0x33   : > { %436 = dma.done.wait (%p644_p6), %s160_s5, 128  }
  0x34   : > { %438 = vsyncadd (%p644_p6), %s160_s5, 4294967168  ;;  %vm189_vm0 = vcmask 261120   ;;  %v188_v0 = vld [vmem:[%s163_s9] sm:$0xff]  ;;  %s314_s8 = sshll.u32 %s502_s16, 7  ;;  %s185_s10 = scalar_lea.vmem [#allocation5], %s309_s30 }
  0x35   : > { %v190_v1 = vsel %vm189_vm0, %v188_v0, 0.0  ;;  %v311_v11 = vld [vmem:[%s632_s1] ss:$0 sm:$0xff]  ;;  %s233_s11 = sshll.u32 %s185_s10, 4  ;;  %s231_s20 = scalar_lea.hbm %s634_s3, %s314_s8  ;;  %s234_s11 = int_to_ptr.vmem [resolvable:$true] %s233_s11 }
  0x36   : > { %191 = vadd.xlane.f32.xlu0 %v190_v1  ;;  %v312_v13 = vld [vmem:[%s633_s2] ss:$0 sm:$0xff]  ;;  %s220_s22 = scalar_lea.sflag [#allocation4], %s579_s29  ;;  %s393_s26 = scalar_lea.vmem %s234_s11, 128 }
  0x37   : > { %p394_p11 = scmp.ne.s32.totalorder %s234_s11, %s393_s26  ;;  %p645_p12 = scmp.ne.s32.totalorder %s639_s24, 0 }
  0x38   : > { %s460_s27 = smov [#allocation5]  }
  0x39   : > { %p395_p13 = pnand %p394_p11, %p645_p12  ;;  %s397_s28 = sshll.u32 %s460_s27, 4  ;;  %s398_s28 = int_to_ptr.vmem [resolvable:$false] %s397_s28 }
  0x3a   : > { %s399_s16 = scalar_lea.vmem %s398_s28, 256  ;;  %p400_p3 = scmp.lt.s32.totalorder %s234_s11, %s398_s28 }
  0x3b   : > { %p396_p1 = pneg %p395_p13  ;;  %p401_p5 = scmp.lt.s32.totalorder %s399_s16, %s393_s26 }
  0x3d   : > { %p402_p8 = por %p401_p5, %p400_p3 }
  0x3f   : > { %p403_p10 = pnand %p402_p8, %p396_p1 }
  0xbf   : > { %v192_v2 = vpop.xlane.xlu0 %191 }
  0xc0   : > { %v194_v3 = vmul.f32 0.03125, %v192_v2 }
  0xc2   : > { %v195_v4 = vsub.f32 %v188_v0, %v194_v3 }
  0xc4   : > { %v196_v5 = vmul.f32 %v195_v4, %v195_v4 }
  0xc6   : > { %v197_v6 = vsel %vm189_vm0, %v196_v5, 0.0 }
  0xc7   : > { %198 = vadd.xlane.f32.xlu0 %v197_v6 }
 0x150   : > { %v199_v7 = vpop.xlane.xlu0 %198 }
 0x151   : > { %v200_v8 = vmul.f32 0.03125, %v199_v7 }
 0x153   : > { %v201_v9 = vadd.f32 1e-05, %v200_v8 }
 0x155   : > { %363 = vrsqrt.f32 %v201_v9 }
 0x162   : > { %v364_v10 = vpop.eup %363 }
 0x163   : > { %v203_v12 = vmul.f32 %v364_v10, %v195_v4 }
 0x165   : > { %v210_v14 = vmul.f32 %v311_v11, %v203_v12 }
 0x167   : > { %v217_v15 = vadd.f32 %v312_v13, %v210_v14 }
 0x169   : > { %218 = vst.msk [vmem:[%s185_s10] sm:$0xff] %vm189_vm0, %v217_v15 }
 0x16a   : > { %406 = shalt.err (!%p403_p10)
}
 0x16b   : > { %s407_s30 = scalar_lea.hbm %s231_s20, 128  ;;  %s411_s9 = scalar_lea.hbm %s634_s3, 256 }
 0x16c   : > { %p408_p2 = scmp.ne.s32.totalorder %s231_s20, %s407_s30  ;;  %p412_p7 = scmp.lt.s32.totalorder %s231_s20, %s634_s3 }
 0x16d   : > { %p413_p0 = scmp.lt.s32.totalorder %s411_s9, %s407_s30 }
 0x16e   : > { %p409_p4 = pnand %p408_p2, %p645_p12 }
 0x16f   : > { %p414_p6 = por %p413_p0, %p412_p7 }
 0x170   : > { %p410_p9 = pneg %p409_p4 }
 0x172   : > { %p415_p11 = pnand %p414_p6, %p410_p9 }
 0x174   : > { %418 = shalt.err (!%p415_p11)
}
 0x175   : > { %319 = dma.vmem_to_hbm [thread:$0]  (%p645_p12), %s234_s11, 128, %s231_s20, %s220_s22  }
 0x176 PF: > { %s245_s6 = sand.u32 1, %s445_s12   ;;  %p646_p13 = scmp.ne.s32.totalorder %s640_s25, 0 }
 0x177   : > { %p647_p1 = scmp.ge.s32.totalorder %s457_s15, 2  ;;  %s246_s7 = scalar_lea.sflag [#allocation4], %s245_s6 }
 0x179   : > { %p326_p3 = pnand %p647_p1, %p646_p13 }
 0x17b   : > { %p327_p5 = pneg %p326_p3 }
 0x17d   : > { %440 = dma.done.wait (%p327_p5), %s246_s7, 128  }
 0x17e   : > { %442 = vsyncadd (%p327_p5), %s246_s7, 4294967168  ;;  %p16_p8 = scmp.ge.s32.totalorder %s506_s18, 4   ;;  %s648_s12 = smov %s449_s13 }
 0x17f   : > { %s649_s13 = smov %s453_s14  ;;  %s650_s14 = smov %s518_s21 }
 0x180   : > { %s651_s15 = smov %s506_s18  ;;  %18 = sbr.rel (!%p16_p8) target bundleno = 5 (0x5), region = 77 }
 0x185   :  { %251 = vsyncpa [#allocation3], 1 }
 0x186   :  { %253 = vsyncpa [#allocation3 + $0x1], 1 }
 0x187   :  { %254 = vsyncpa [#allocation4], 1 }
 0x188   :  { %256 = vsyncpa [#allocation4 + $0x1], 1 }

</bundles_post_ra>
